<compile_context>
chip_gen: v6e
topology: v6e:2x2x1
jax: 0.10.0
libtpu: 0.0.40
codegen_flags: <defaults>
</compile_context>

<pallas_src>
import functools

import jax
import jax.numpy as jnp
from jax.experimental import pallas as pl
from jax.experimental.pallas import tpu as pltpu

# Default batch tile (lane-axis width per grid step). Sweep {1024, 2048, 4096,
# 8192} when profiling; at 4096 the live activations are ~2-3 MiB.
TILE_B = 4096

# Batches at or below this run as one full-extent block (single grid step);
# above it we force a tile that is a multiple of 128 lanes and gives >= 2 grid
# steps so the "parallel" batch axis can feed both TensorCores on v7x.
_SINGLE_BLOCK_MAX = 256


def _mlp_kernel(x_ref, w1_ref, b1_ref, w2_ref, b2_ref, w3_ref, b3_ref, o_ref,
                *, precision):
    """Fused MLP forward for one lane-dense batch tile.

    x_ref:  (state_dim, TILE_B)  compute dtype (f32 or bf16)
    w*_ref: (out, in)            weights, compute dtype (VMEM-resident)
    b*_ref: (out, 1)             biases, f32 (broadcast over the lane axis)
    o_ref:  (action_dim, TILE_B) f32
    """
    cdt = w1_ref.dtype
    x = x_ref[...]

    h1 = jnp.dot(w1_ref[...], x, precision=precision,
                 preferred_element_type=jnp.float32) + b1_ref[...]
    h1 = jnp.maximum(h1, 0.0)

    h2 = jnp.dot(w2_ref[...], h1.astype(cdt), precision=precision,
                 preferred_element_type=jnp.float32) + b2_ref[...]
    h2 = jnp.maximum(h2, 0.0)

    out = jnp.dot(w3_ref[...], h2.astype(cdt), precision=precision,
                  preferred_element_type=jnp.float32) + b3_ref[...]
    o_ref[...] = jnp.clip(out, -1.0, 1.0).astype(o_ref.dtype)


def _round_up(x: int, m: int) -> int:
    return ((x + m - 1) // m) * m


def _resident_spec(shape):
    # Whole-array block pinned to (0, 0) every grid step -> weights / biases
    # stay VMEM-resident across the batch loop. (pl.Buffered(1) would also drop
    # their pointless double buffer, but they total ~19 KiB, so we skip it.)
    return pl.BlockSpec(shape, lambda i: (0, 0))


@functools.partial(jax.jit, static_argnames=("tile_b", "compute_dtype"))
def deep_nn_approximator_forward(state, params, *, tile_b: int = TILE_B,
                                 compute_dtype=jnp.float32):
    """Pallas forward pass for DeepNNApproximator.

    state:  (B, state_dim) f32
    params: w1 (h1, state_dim), b1 (h1, 1), w2 (h2, h1), b2 (h2, 1),
            w3 (action_dim, h2), b3 (action_dim, 1)   [PyTorch (out, in) layout]
    returns (B, action_dim) f32, clamped to [-1, 1].

    compute_dtype=jnp.bfloat16 halves HBM/VMEM bytes for state + weights and
    uses the native bf16 MXU path (recommended on v6e / v7x); accumulation
    stays f32 via preferred_element_type. Keep the f32 default on v5e.
    """
    B, state_dim = state.shape
    action_dim = params["w3"].shape[0]

    # Lane-dense layout: batch on the 128-wide lane axis.
    x_t = state.T.astype(compute_dtype)                     # (state_dim, B)
    w1 = params["w1"].astype(compute_dtype)
    w2 = params["w2"].astype(compute_dtype)
    w3 = params["w3"].astype(compute_dtype)
    b1, b2, b3 = params["b1"], params["b2"], params["b3"]   # stay f32

    # Effective batch tile: small batches -> one full-extent block; otherwise a
    # multiple of 128 lanes giving >= 2 grid steps (v7x megacore), cap tile_b.
    if B <= _SINGLE_BLOCK_MAX:
        eff_tile = B
    else:
        eff_tile = min(tile_b, _round_up(pl.cdiv(B, 2), 128))
    grid = (pl.cdiv(B, eff_tile),)   # ragged last block: OOB writes are masked

    # f32 path: exact f32 matmuls in both kernel and reference; bf16: native.
    precision = (jax.lax.Precision.HIGHEST
                 if compute_dtype == jnp.float32 else None)

    out_t = pl.pallas_call(
        functools.partial(_mlp_kernel, precision=precision),
        out_shape=jax.ShapeDtypeStruct((action_dim, B), jnp.float32),
        grid=grid,
        in_specs=[
            # Batch-tiled, lane-dense input: the only HBM stream scaling with B.
            pl.BlockSpec((state_dim, eff_tile), lambda i: (0, i)),
            _resident_spec(w1.shape), _resident_spec(b1.shape),
            _resident_spec(w2.shape), _resident_spec(b2.shape),
            _resident_spec(w3.shape), _resident_spec(b3.shape),
        ],
        out_specs=pl.BlockSpec((action_dim, eff_tile), lambda i: (0, i)),
        compiler_params=pltpu.CompilerParams(
            # Batch tiles are independent -> megacore-shardable on v7x.
            dimension_semantics=("parallel",),
            # Explicit scoped-VMEM limit: identical behaviour on v5e/v6e/v7x.
            vmem_limit_bytes=32 * 1024 * 1024,
        ),
    )(x_t, w1, b1, w2, b2, w3, b3)

    return out_t.T                                           # (B, action_dim)


def init_params(key, state_dim=8, hidden_layers=(64, 64), action_dim=2):
    """nn.Linear-style U(-1/sqrt(fan_in), 1/sqrt(fan_in)) init.

    Weights in PyTorch's native (out_features, in_features) layout; biases as
    (out_features, 1) so they broadcast over the lane/batch axis in-kernel.
    """
    dims = [state_dim, *hidden_layers, action_dim]
    params = {}
    for i in range(len(dims) - 1):
        fan_in, fan_out = dims[i], dims[i + 1]
        key, kw, kb = jax.random.split(key, 3)
        bound = 1.0 / (fan_in ** 0.5)
        params[f"w{i + 1}"] = jax.random.uniform(
            kw, (fan_out, fan_in), jnp.float32, minval=-bound, maxval=bound)
        params[f"b{i + 1}"] = jax.random.uniform(
            kb, (fan_out, 1), jnp.float32, minval=-bound, maxval=bound)
    return params


def reference_forward(state, params, compute_dtype=jnp.float32):
    """Pure-JAX reference mirroring the kernel's dtypes and matmul precision."""
    cdt = compute_dtype
    prec = jax.lax.Precision.HIGHEST if cdt == jnp.float32 else None
    x = state.astype(cdt)
    h1 = jnp.maximum(
        jnp.dot(x, params["w1"].astype(cdt).T, precision=prec,
                preferred_element_type=jnp.float32) + params["b1"][:, 0], 0.0)
    h2 = jnp.maximum(
        jnp.dot(h1.astype(cdt), params["w2"].astype(cdt).T, precision=prec,
                preferred_element_type=jnp.float32) + params["b2"][:, 0], 0.0)
    out = jnp.dot(h2.astype(cdt), params["w3"].astype(cdt).T, precision=prec,
                  preferred_element_type=jnp.float32) + params["b3"][:, 0]
    return jnp.clip(out, -1.0, 1.0)


if __name__ == "__main__":
    key = jax.random.PRNGKey(0)
    state_dim, action_dim = 8, 2
    params = init_params(key, state_dim=state_dim, hidden_layers=(64, 64),
                         action_dim=action_dim)

    # 1) Small batch (spec-consistent): single full-extent block.
    key, kx = jax.random.split(key)
    state_small = jax.random.normal(kx, (4, state_dim), jnp.float32)
    out_small = jax.block_until_ready(
        deep_nn_approximator_forward(state_small, params))
    ref_small = reference_forward(state_small, params)
    assert out_small.shape == (4, action_dim)
    assert jnp.allclose(out_small, ref_small, atol=1e-5, rtol=1e-5), \
        "small-batch mismatch vs reference"

    # 2) Multi-step grid with a ragged last block (no host padding). tile_b is
    #    kept small here only so the test exercises >1 grid step at a small B.
    key, kx = jax.random.split(key)
    state_big = jax.random.normal(kx, (645, state_dim), jnp.float32)
    out_big = jax.block_until_ready(
        deep_nn_approximator_forward(state_big, params, tile_b=256))
    ref_big = reference_forward(state_big, params)
    assert out_big.shape == (645, action_dim)
    assert jnp.allclose(out_big, ref_big, atol=1e-5, rtol=1e-5), \
        "tiled-batch mismatch vs reference"

    # 3) bf16 compute path (the v6e / v7x option): bf16 operands, f32 accum.
    out_bf16 = jax.block_until_ready(
        deep_nn_approximator_forward(state_big, params, tile_b=256,
                                     compute_dtype=jnp.bfloat16))
    ref_bf16 = reference_forward(state_big, params, compute_dtype=jnp.bfloat16)
    assert out_bf16.shape == (645, action_dim)
    assert jnp.allclose(out_bf16, ref_bf16, atol=1e-2, rtol=1e-2), \
        "bf16-path mismatch vs bf16 reference"

    print("KERNEL_OK")
</pallas_src>

<mosaic_0001>
module attributes {stable_mosaic.version = 11 : i64} {
  func.func @_mlp_kernel(%arg0: i32, %arg1: memref<8x4xf32, #tpu.memory_space<vmem>>, %arg2: memref<64x8xf32, #tpu.memory_space<vmem>>, %arg3: memref<64x1xf32, #tpu.memory_space<vmem>>, %arg4: memref<64x64xf32, #tpu.memory_space<vmem>>, %arg5: memref<64x1xf32, #tpu.memory_space<vmem>>, %arg6: memref<2x64xf32, #tpu.memory_space<vmem>>, %arg7: memref<2x1xf32, #tpu.memory_space<vmem>>, %arg8: memref<2x4xf32, #tpu.memory_space<vmem>>) attributes {dimension_semantics = [#tpu.dimension_semantics<parallel>], iteration_bounds = array<i64: 1>, scalar_prefetch = 0 : i64, scratch_operands = 0 : i64, tpu.core_type = #tpu.core_type<tc>, window_params = [{transform_indices = @transform_0, window_bounds = array<i64: 8, 4>}, {pipeline_mode = #tpu.pipeline_mode<synchronous>, transform_indices = @transform_1, window_bounds = array<i64: 64, 8>}, {pipeline_mode = #tpu.pipeline_mode<synchronous>, transform_indices = @transform_2, window_bounds = array<i64: 64, 1>}, {pipeline_mode = #tpu.pipeline_mode<synchronous>, transform_indices = @transform_3, window_bounds = array<i64: 64, 64>}, {pipeline_mode = #tpu.pipeline_mode<synchronous>, transform_indices = @transform_4, window_bounds = array<i64: 64, 1>}, {pipeline_mode = #tpu.pipeline_mode<synchronous>, transform_indices = @transform_5, window_bounds = array<i64: 2, 64>}, {pipeline_mode = #tpu.pipeline_mode<synchronous>, transform_indices = @transform_6, window_bounds = array<i64: 2, 1>}, {transform_indices = @transform_7, window_bounds = array<i64: 2, 4>}]} {
    %c0 = arith.constant 0 : index
    %c0_0 = arith.constant 0 : index
    %0 = vector.load %arg1[%c0, %c0_0] : memref<8x4xf32, #tpu.memory_space<vmem>>, vector<8x4xf32>
    %c0_1 = arith.constant 0 : index
    %c0_2 = arith.constant 0 : index
    %1 = vector.load %arg2[%c0_1, %c0_2] : memref<64x8xf32, #tpu.memory_space<vmem>>, vector<64x8xf32>
    %cst = arith.constant dense<0.000000e+00> : vector<64x4xf32>
    %2 = tpu.matmul %1, %0, %cst {dimension_numbers = #tpu.dot_dimension_numbers<[1], [0], [0], [1], [0, 0, 1, 1], [], []>, precision = #tpu.contract_precision<fp32>} : vector<64x8xf32>, vector<8x4xf32>, vector<64x4xf32> -> vector<64x4xf32>
    %c0_3 = arith.constant 0 : index
    %c0_4 = arith.constant 0 : index
    %3 = vector.load %arg3[%c0_3, %c0_4] : memref<64x1xf32, #tpu.memory_space<vmem>>, vector<64x1xf32>
    %4 = vector.broadcast %3 : vector<64x1xf32> to vector<64x4xf32>
    %5 = arith.addf %2, %4 : vector<64x4xf32>
    %cst_5 = arith.constant 0.000000e+00 : f32
    %6 = vector.broadcast %cst_5 : f32 to vector<64x4xf32>
    %7 = arith.maximumf %5, %6 : vector<64x4xf32>
    %c0_6 = arith.constant 0 : index
    %c0_7 = arith.constant 0 : index
    %8 = vector.load %arg4[%c0_6, %c0_7] : memref<64x64xf32, #tpu.memory_space<vmem>>, vector<64x64xf32>
    %cst_8 = arith.constant dense<0.000000e+00> : vector<64x4xf32>
    %9 = tpu.matmul %8, %7, %cst_8 {dimension_numbers = #tpu.dot_dimension_numbers<[1], [0], [0], [1], [0, 0, 1, 1], [], []>, precision = #tpu.contract_precision<fp32>} : vector<64x64xf32>, vector<64x4xf32>, vector<64x4xf32> -> vector<64x4xf32>
    %c0_9 = arith.constant 0 : index
    %c0_10 = arith.constant 0 : index
    %10 = vector.load %arg5[%c0_9, %c0_10] : memref<64x1xf32, #tpu.memory_space<vmem>>, vector<64x1xf32>
    %11 = vector.broadcast %10 : vector<64x1xf32> to vector<64x4xf32>
    %12 = arith.addf %9, %11 : vector<64x4xf32>
    %cst_11 = arith.constant 0.000000e+00 : f32
    %13 = vector.broadcast %cst_11 : f32 to vector<64x4xf32>
    %14 = arith.maximumf %12, %13 : vector<64x4xf32>
    %c0_12 = arith.constant 0 : index
    %c0_13 = arith.constant 0 : index
    %15 = vector.load %arg6[%c0_12, %c0_13] : memref<2x64xf32, #tpu.memory_space<vmem>>, vector<2x64xf32>
    %cst_14 = arith.constant dense<0.000000e+00> : vector<2x4xf32>
    %16 = tpu.matmul %15, %14, %cst_14 {dimension_numbers = #tpu.dot_dimension_numbers<[1], [0], [0], [1], [0, 0, 1, 1], [], []>, precision = #tpu.contract_precision<fp32>} : vector<2x64xf32>, vector<64x4xf32>, vector<2x4xf32> -> vector<2x4xf32>
    %c0_15 = arith.constant 0 : index
    %c0_16 = arith.constant 0 : index
    %17 = vector.load %arg7[%c0_15, %c0_16] : memref<2x1xf32, #tpu.memory_space<vmem>>, vector<2x1xf32>
    %18 = vector.broadcast %17 : vector<2x1xf32> to vector<2x4xf32>
    %19 = arith.addf %16, %18 : vector<2x4xf32>
    %cst_17 = arith.constant -1.000000e+00 : f32
    %cst_18 = arith.constant 1.000000e+00 : f32
    %20 = vector.broadcast %cst_17 : f32 to vector<2x4xf32>
    %21 = arith.maximumf %20, %19 : vector<2x4xf32>
    %22 = vector.broadcast %cst_18 : f32 to vector<2x4xf32>
    %23 = arith.minimumf %22, %21 : vector<2x4xf32>
    %c0_19 = arith.constant 0 : index
    %c0_20 = arith.constant 0 : index
    %24 = vector.load %arg8[%c0_19, %c0_20] : memref<2x4xf32, #tpu.memory_space<vmem>>, vector<2x4xf32>
    tpu.vector_store %arg8[%c0_19, %c0_20], %23 {strides = array<i32>} : memref<2x4xf32, #tpu.memory_space<vmem>>, vector<2x4xf32>,
    return
  }
  func.func @transform_0(%arg0: i32) -> (i32, i32) {
    %c0_i32 = arith.constant 0 : i32
    %c0_i32_0 = arith.constant 0 : i32
    return %c0_i32, %arg0 : i32, i32
  }
  func.func @transform_1(%arg0: i32) -> (i32, i32) {
    %c0_i32 = arith.constant 0 : i32
    %c0_i32_0 = arith.constant 0 : i32
    %c0_i32_1 = arith.constant 0 : i32
    return %c0_i32, %c0_i32_0 : i32, i32
  }
  func.func @transform_2(%arg0: i32) -> (i32, i32) {
    %c0_i32 = arith.constant 0 : i32
    %c0_i32_0 = arith.constant 0 : i32
    %c0_i32_1 = arith.constant 0 : i32
    return %c0_i32, %c0_i32_0 : i32, i32
  }
  func.func @transform_3(%arg0: i32) -> (i32, i32) {
    %c0_i32 = arith.constant 0 : i32
    %c0_i32_0 = arith.constant 0 : i32
    %c0_i32_1 = arith.constant 0 : i32
    return %c0_i32, %c0_i32_0 : i32, i32
  }
  func.func @transform_4(%arg0: i32) -> (i32, i32) {
    %c0_i32 = arith.constant 0 : i32
    %c0_i32_0 = arith.constant 0 : i32
    %c0_i32_1 = arith.constant 0 : i32
    return %c0_i32, %c0_i32_0 : i32, i32
  }
  func.func @transform_5(%arg0: i32) -> (i32, i32) {
    %c0_i32 = arith.constant 0 : i32
    %c0_i32_0 = arith.constant 0 : i32
    %c0_i32_1 = arith.constant 0 : i32
    return %c0_i32, %c0_i32_0 : i32, i32
  }
  func.func @transform_6(%arg0: i32) -> (i32, i32) {
    %c0_i32 = arith.constant 0 : i32
    %c0_i32_0 = arith.constant 0 : i32
    %c0_i32_1 = arith.constant 0 : i32
    return %c0_i32, %c0_i32_0 : i32, i32
  }
  func.func @transform_7(%arg0: i32) -> (i32, i32) {
    %c0_i32 = arith.constant 0 : i32
    %c0_i32_0 = arith.constant 0 : i32
    return %c0_i32, %arg0 : i32, i32
  }
}

</mosaic_0001>

<bundles_post_ra>
// kernel: deep_nn_approximator_forward.1
= control target key start
LH: loop header
LB: loop body
LE: loop exit
PB: predicated region body
PF: predicated region fallthrough
CT: control target
= control target key end

     0   :  { %vm84_vm0 = vcmask 64512   ;;  %v2955_v9 = vmov 0   ;;  %s3733_s0 = inlined_call_operand.vmem [shape: f32[8,4], index: 0, kind: input, shape index: {}]   ;;  %s3734_s1 = inlined_call_operand.vmem [shape: f32[64,8], index: 1, kind: input, shape index: {}]   ;;  %s3735_s2 = inlined_call_operand.vmem [shape: f32[64,1], index: 2, kind: input, shape index: {}]   ;;  %s3736_s3 = inlined_call_operand.vmem [shape: f32[64,64], index: 3, kind: input, shape index: {}]   ;;  %s3737_s4 = inlined_call_operand.vmem [shape: f32[64,1], index: 4, kind: input, shape index: {}]   ;;  %s3738_s5 = inlined_call_operand.vmem [shape: f32[2,64], index: 5, kind: input, shape index: {}]   ;;  %s3739_s6 = inlined_call_operand.vmem [shape: f32[2,1], index: 6, kind: input, shape index: {}]   ;;  %s3740_s7 = inlined_call_operand.hbm [shape: f32[2,4], index: 7, kind: output, shape index: {}]  }
   0x1   :  { %v27_v0 = vld [vmem:[%s3733_s0] sm:$0xff]  ;;  %v29_v2 = vld [vmem:[%s3734_s1 + $0x8] sm:$0xff]  ;;  %v30_v6 = vld [vmem:[%s3734_s1 + $0x10] sm:$0xff]  ;;  %2931 = vset.pattern.permute.xlu0 %v2955_v9  ;;  %2932 = vset.pattern.permute.xlu1 %v2955_v9 }
   0x2   :  { %v28_v1 = vld [vmem:[%s3734_s1] sm:$0xff]  ;;  %v3008_v3 = vand.u32 4294901760, %v27_v0  ;;  %v89_v5 = vsel %vm84_vm0, %v29_v2, 0  ;;  %v31_v7 = vld [vmem:[%s3734_s1 + $0x18] sm:$0xff]  ;;  %v92_v12 = vsel %vm84_vm0, %v30_v6, 0  ;;  %v33_v14 = vld [vmem:[%s3734_s1 + $0x28] sm:$0xff] }
   0x3   :  { %v86_v4 = vsel %vm84_vm0, %v28_v1, 0  ;;  %v32_v8 = vld [vmem:[%s3734_s1 + $0x20] sm:$0xff]  ;;  %v3023_v11 = vand.u32 4294901760, %v89_v5  ;;  %v95_v13 = vsel %vm84_vm0, %v31_v7, 0  ;;  %v3032_v16 = vand.u32 4294901760, %v92_v12  ;;  %v34_v19 = vld [vmem:[%s3734_s1 + $0x30] sm:$0xff] }
   0x4   :  { %v3021_v10 = vand.u32 4294901760, %v86_v4  ;;  %2561 = vmatprep.subr.mxu0 %v3008_v3  ;;  %v287_v15 = vsub.f32 %v27_v0, %v3008_v3  ;;  %v3034_v17 = vand.u32 4294901760, %v95_v13  ;;  %v98_v18 = vsel %vm84_vm0, %v32_v8, 0  ;;  %v43_v20 = vld [vmem:[%s3735_s2 + $0x38] sm:$0xff]  ;;  %v41_v21 = vld [vmem:[%s3735_s2 + $0x28] sm:$0xff]  ;;  %v42_v34 = vld [vmem:[%s3735_s2 + $0x30] sm:$0xff] }
   0x5   :  { %2562 = vmatpush3.msra.mxu0 %v3008_v3  ;;  %v3052_v23 = vsub.f32 %v89_v5, %v3023_v11  ;;  %v3054_v24 = vand.u32 4294901760, %v98_v18  ;;  %v101_v25 = vsel %vm84_vm0, %v33_v14, 0  ;;  %v3060_v27 = vsub.f32 %v92_v12, %v3032_v16  ;;  %81 = vperm.xlu0 %2931, %v43_v20   ;;  %v40_v39 = vld [vmem:[%s3735_s2 + $0x20] sm:$0xff]  ;;  %v35_v44 = vld [vmem:[%s3734_s1 + $0x38] sm:$0xff] }
   0x6   :  { %v3048_v22 = vsub.f32 %v86_v4, %v3021_v10  ;;  %2577 = vmatprep.mubr.f32.mxu1 %v3021_v10  ;;  %v3057_v26 = vand.u32 4294901760, %v287_v15  ;;  %2589 = vmatprep.subr.mxu0 %v287_v15  ;;  %v3063_v28 = vsub.f32 %v95_v13, %v3034_v17  ;;  %v3065_v29 = vand.u32 4294901760, %v101_v25 }
   0x7   :  { %v187_v31 = vand.u32 4294901760, %v3052_v23  ;;  %v3070_v32 = vsub.f32 %v98_v18, %v3054_v24  ;;  %v104_v33 = vsel %vm84_vm0, %v34_v19, 0  ;;  %71 = vperm.xlu1 %2932, %v41_v21   ;;  %v197_v36 = vand.u32 4294901760, %v3060_v27 }
   0x8   :  { %v177_v30 = vand.u32 4294901760, %v3048_v22  ;;  %v289_v35 = vsub.f32 %v287_v15, %v3057_v26  ;;  %v207_v37 = vand.u32 4294901760, %v3063_v28  ;;  %v3080_v38 = vsub.f32 %v101_v25, %v3065_v29 }
   0x9   :  { %v188_v41 = vsub.f32 %v3052_v23, %v187_v31  ;;  %v217_v42 = vand.u32 4294901760, %v3070_v32  ;;  %v3092_v43 = vand.u32 4294901760, %v104_v33  ;;  %v198_v46 = vsub.f32 %v3060_v27, %v197_v36  ;;  %76 = vperm.xlu0 %2931, %v42_v34  }
   0xa   :  { %v178_v40 = vsub.f32 %v3048_v22, %v177_v30  ;;  %v290_v45 = vand.u32 4294901760, %v289_v35  ;;  %v208_v47 = vsub.f32 %v3063_v28, %v207_v37  ;;  %v227_v48 = vand.u32 4294901760, %v3080_v38 }
   0xb   :  { %12 = vsyncpa [#allocation3], 0  ;;  %v189_v50 = vand.u32 4294901760, %v188_v41  ;;  %v218_v51 = vsub.f32 %v3070_v32, %v217_v42  ;;  %v3108_v52 = vsub.f32 %v104_v33, %v3092_v43  ;;  %66 = vperm.xlu1 %2932, %v40_v39   ;;  %v199_v53 = vand.u32 4294901760, %v198_v46  ;;  %v39_v63 = vld [vmem:[%s3735_s2 + $0x18] sm:$0xff]  ;;  %v38_v1 = vld [vmem:[%s3735_s2 + $0x10] sm:$0xff] }
   0xc   :  { %v179_v49 = vand.u32 4294901760, %v178_v40  ;;  %2575 = vmatprep.subr.mxu1 %v290_v45  ;;  %v107_v54 = vsel %vm84_vm0, %v35_v44, 0  ;;  %v209_v57 = vand.u32 4294901760, %v208_v47  ;;  %v228_v58 = vsub.f32 %v3080_v38, %v227_v48  ;;  %v37_v5 = vld [vmem:[%s3735_s2 + $0x8] sm:$0xff]  ;;  %v36_v7 = vld [vmem:[%s3735_s2] sm:$0xff]  ;;  %v879_v8 = vld [vmem:[%s3737_s4 + $0x38] sm:$0xff] }
   0xd   :  { %2576 = vmatpush3.msra.mxu1 %v290_v45  ;;  %v237_v55 = vand.u32 4294901760, %v3108_v52  ;;  %v3112_v56 = vand.u32 4294901760, %v107_v54  ;;  %v219_v59 = vand.u32 4294901760, %v218_v51  ;;  %61 = vperm.xlu0 %2931, %v39_v63   ;;  %v878_v9 = vld [vmem:[%s3737_s4 + $0x30] sm:$0xff]  ;;  %v877_v12 = vld [vmem:[%s3737_s4 + $0x28] sm:$0xff]  ;;  %v876_v13 = vld [vmem:[%s3737_s4 + $0x20] sm:$0xff] }
   0xe   :  { %2563 = vmatprep.mubr.f32.mxu0 %v179_v49  ;;  %2578 = vmatmul.mubr.f32.vlgmr.msra.gmra.mxu1 %v3023_v11  ;;  %v229_v0 = vand.u32 4294901760, %v228_v58  ;;  %v875_v14 = vld [vmem:[%s3737_s4 + $0x18] sm:$0xff]  ;;  %v872_v18 = vld [vmem:[%s3737_s4] sm:$0xff]  ;;  %vm920_vm1 = vcmask 523264   ;;  %vm2957_vm2 = vmmov 0   ;;  %vm2340_vm3 = vcmask 25600  }
   0xf   :  { %2564 = vmatmul.mubr.f32.vlgmr.msra.gmra.mxu0 %v189_v50  ;;  %2603 = vmatprep.subr.mxu1 %v3008_v3  ;;  %v238_v60 = vsub.f32 %v3108_v52, %v237_v55  ;;  %v246_v61 = vsub.f32 %v107_v54, %v3112_v56  ;;  %v1792_v19 = vld [vmem:[%s3739_s6] sm:$0x3] }
  0x10   :  { %2590 = vmatpush3.msra.mxu0 %v287_v15  ;;  %2566 = vmatprep.mubr.f32.mxu0 %v199_v53  ;;  %v874_v15 = vld [vmem:[%s3737_s4 + $0x10] sm:$0xff] }
  0x11   :  { %2580 = vmatprep.mubr.f32.mxu1 %v3032_v16  ;;  %2604 = vmatpush3.msra.mxu1 %v3008_v3  ;;  %v247_v62 = vand.u32 4294901760, %v246_v61  ;;  %v239_v2 = vand.u32 4294901760, %v238_v60 }
  0x12   :  { %2617 = vmatprep.subr.mxu0 %v3057_v26  ;;  %2581 = vmatmul.mubr.f32.gmra.mxu1 %v3034_v17 }
  0x13   :  { %2567 = vmatmul.mubr.f32.gmra.mxu0 %v209_v57  ;;  %2583 = vmatprep.mubr.f32.mxu1 %v3054_v24  ;;  %v248_v4 = vsub.f32 %v246_v61, %v247_v62 }
  0x14   :  { %2569 = vmatprep.mubr.f32.mxu0 %v219_v59  ;;  %2631 = vmatprep.subr.mxu1 %v3008_v3 }
  0x15   :  { %56 = vperm.xlu1 %2932, %v38_v1   ;;  %v249_v6 = vand.u32 4294901760, %v248_v4  ;;  %51 = vperm.xlu0 %2931, %v37_v5  }
  0x16   :  { %2584 = vmatmul.mubr.f32.gmra.mxu1 %v3065_v29 }
  0x17   :  { %2570 = vmatmul.mubr.f32.gmra.mxu0 %v229_v0  ;;  %2586 = vmatprep.mubr.f32.mxu1 %v3092_v43 }
  0x18   :  { %2572 = vmatprep.mubr.f32.mxu0 %v239_v2 }
  0x19   :  { %46 = vperm.xlu1 %2932, %v36_v7   ;;  %917 = vperm.xlu0 %2931, %v879_v8  }
  0x1a   :  { %2587 = vmatmul.mubr.f32.gmra.mxu1 %v3112_v56 }
  0x1b   :  { %2573 = vmatmul.mubr.f32.gmra.mxu0 %v249_v6  ;;  %2605 = vmatprep.mubr.f32.mxu1 %v177_v30 }
  0x1c   :  { %2591 = vmatprep.mubr.f32.mxu0 %v3048_v22 }
  0x1d   :  { %912 = vperm.xlu1 %2932, %v878_v9   ;;  %907 = vperm.xlu0 %2931, %v877_v12  }
  0x1e   :  { %2606 = vmatmul.mubr.f32.vlgmr.msra.gmra.mxu1 %v187_v31 }
  0x1f   :  { %2592 = vmatmul.mubr.f32.vlgmr.msra.gmra.mxu0 %v3052_v23  ;;  %2608 = vmatprep.mubr.f32.mxu1 %v197_v36 }
  0x20   :  { %2618 = vmatpush3.msra.mxu0 %v3057_v26  ;;  %2594 = vmatprep.mubr.f32.mxu0 %v3060_v27 }
  0x21   :  { %2632 = vmatpush3.msra.mxu1 %v3008_v3  ;;  %902 = vperm.xlu1 %2932, %v876_v13   ;;  %v873_v3 = vld [vmem:[%s3737_s4 + $0x8] sm:$0xff] }
  0x22   :  { %2609 = vmatmul.mubr.f32.gmra.mxu1 %v207_v37  ;;  %897 = vperm.xlu0 %2931, %v875_v14  }
  0x23   :  { %2595 = vmatmul.mubr.f32.gmra.mxu0 %v3063_v28  ;;  %2611 = vmatprep.mubr.f32.mxu1 %v217_v42 }
  0x24   :  { %2597 = vmatprep.mubr.f32.mxu0 %v3070_v32 }
  0x25   :  { %892 = vperm.xlu1 %2932, %v874_v15  }
  0x26   :  { %2612 = vmatmul.mubr.f32.gmra.mxu1 %v227_v48  ;;  %887 = vperm.xlu0 %2931, %v873_v3  }
  0x27   :  { %2598 = vmatmul.mubr.f32.gmra.mxu0 %v3080_v38  ;;  %2614 = vmatprep.mubr.f32.mxu1 %v237_v55 }
  0x28   :  { %2600 = vmatprep.mubr.f32.mxu0 %v3108_v52 }
  0x29   :  { %882 = vperm.xlu1 %2932, %v872_v18  }
  0x2a   :  { %2615 = vmatmul.mubr.f32.gmra.mxu1 %v247_v62  ;;  %1795 = vperm.xlu0 %2931, %v1792_v19  }
  0x2b   :  { %2601 = vmatmul.mubr.f32.gmra.mxu0 %v246_v61  ;;  %2633 = vmatprep.mubr.f32.mxu1 %v3021_v10 }
  0x2c   :  { %2619 = vmatprep.mubr.f32.mxu0 %v3021_v10  ;;  %v864_v10 = vld [vmem:[%s3736_s3] sm:$0xff] }
  0x2e   :  { %2634 = vmatmul.mubr.f32.vlgmr.msra.gmra.mxu1 %v3023_v11 }
  0x2f   :  { %2620 = vmatmul.mubr.f32.vlgmr.msra.gmra.mxu0 %v3023_v11  ;;  %2636 = vmatprep.mubr.f32.mxu1 %v3032_v16  ;;  %v922_v11 = vsel %vm920_vm1, %v864_v10, 0 }
  0x30   :  { %2622 = vmatprep.mubr.f32.mxu0 %v3032_v16  ;;  %v3214_v16 = vand.u32 4294901760, %v922_v11 }
  0x32   :  { %2637 = vmatmul.mubr.f32.gmra.mxu1 %v3034_v17 }
  0x33   :  { %2623 = vmatmul.mubr.f32.gmra.mxu0 %v3034_v17  ;;  %2639 = vmatprep.mubr.f32.mxu1 %v3054_v24  ;;  %v3217_v17 = vsub.f32 %v922_v11, %v3214_v16 }
  0x34   :  { %2625 = vmatprep.mubr.f32.mxu0 %v3054_v24 }
  0x35   :  { %v1020_v20 = vand.u32 4294901760, %v3217_v17 }
  0x36   :  { %2640 = vmatmul.mubr.f32.gmra.mxu1 %v3065_v29 }
  0x37   :  { %2626 = vmatmul.mubr.f32.gmra.mxu0 %v3065_v29  ;;  %2642 = vmatprep.mubr.f32.mxu1 %v3092_v43  ;;  %v1021_v21 = vsub.f32 %v3217_v17, %v1020_v20 }
  0x38   :  { %2628 = vmatprep.mubr.f32.mxu0 %v3092_v43 }
  0x39   :  { %v1022_v22 = vand.u32 4294901760, %v1021_v21 }
  0x3a   :  { %2643 = vmatmul.mubr.f32.gmra.mxu1 %v3112_v56 }
  0x3b   :  { %2629 = vmatmul.mubr.f32.gmra.mxu0 %v3112_v56  ;;  %2689 = vmatprep.mubr.f32.mxu1 %v3214_v16 }
  0x3c   :  { %2661 = vmatprep.mubr.f32.mxu0 %v1022_v22 }
  0x80   :  { %v82_v35 = vpop.permute.xlu0 %81 }
  0x82   :  { %v72_v38 = vpop.permute.xlu1 %71 }
  0x84   :  { %v77_v43 = vpop.permute.xlu0 %76 }
  0x86   :  { %v67_v46 = vpop.permute.xlu1 %66 }
  0x88   :  { %v62_v51 = vpop.permute.xlu0 %61 }
  0x90   :  { %v57_v54 = vpop.permute.xlu1 %56  ;;  %v52_v60 = vpop.permute.xlu0 %51 }
  0x94   :  { %v47_v1 = vpop.permute.xlu1 %46 }
  0xce   :  { %v2579_v24 = vpop.f32.mrf.mxu1 }
  0xcf   :  { %v2565_v23 = vpop.f32.mrf.mxu0 }
  0xd0   :  { %v327_v26 = vpop.f32.mrf.mxu1  ;;  %v192_v5 = vadd.f32 %v2565_v23, %v52_v60 }
  0xd1   :  { %v181_v25 = vpop.f32.mrf.mxu0 }
  0xd2   :  { %v2582_v28 = vpop.f32.mrf.mxu1  ;;  %v182_v13 = vadd.f32 %v181_v25, %v47_v1  ;;  %v334_v11 = vadd.f32 %v2579_v24, %v192_v5 }
  0xd3   :  { %v2568_v27 = vpop.f32.mrf.mxu0 }
  0xd4   :  { %v339_v30 = vpop.f32.mrf.mxu1  ;;  %v212_v57 = vadd.f32 %v2568_v27, %v62_v51 }
  0xd5   :  { %v201_v29 = vpop.f32.mrf.mxu0 }
  0xd6   :  { %v2585_v32 = vpop.f32.mrf.mxu1  ;;  %v202_v61 = vadd.f32 %v201_v29, %v57_v54  ;;  %v346_v2 = vadd.f32 %v2582_v28, %v212_v57 }
  0xd7   :  { %v2571_v31 = vpop.f32.mrf.mxu0 }
  0xd8   :  { %v351_v34 = vpop.f32.mrf.mxu1  ;;  %v232_v62 = vadd.f32 %v2571_v31, %v72_v38  ;;  %v340_v8 = vadd.f32 %v339_v30, %v202_v61  ;;  %v328_v31 = vadd.f32 %v327_v26, %v182_v13 }
  0xd9   :  { %v221_v33 = vpop.f32.mrf.mxu0 }
  0xda   :  { %v2588_v37 = vpop.f32.mrf.mxu1  ;;  %v222_v4 = vadd.f32 %v221_v33, %v67_v46  ;;  %v358_v14 = vadd.f32 %v2585_v32, %v232_v62 }
  0xdb   :  { %v2574_v36 = vpop.f32.mrf.mxu0 }
  0xdc   :  { %v363_v40 = vpop.f32.mrf.mxu1  ;;  %v252_v9 = vadd.f32 %v2574_v36, %v82_v35  ;;  %v352_v18 = vadd.f32 %v351_v34, %v222_v4 }
  0xdd   :  { %v241_v39 = vpop.f32.mrf.mxu0 }
  0xde   :  { %v2607_v42 = vpop.f32.mrf.mxu1  ;;  %v242_v19 = vadd.f32 %v241_v39, %v77_v43  ;;  %v370_v28 = vadd.f32 %v2588_v37, %v252_v9  ;;  %v865_v37 = vld [vmem:[%s3736_s3 + $0x8] sm:$0xff] }
  0xdf   :  { %v2593_v41 = vpop.f32.mrf.mxu0 }
  0xe0   :  { %v3224_v45 = vpop.f32.mrf.mxu1  ;;  %v451_v33 = vadd.f32 %v2593_v41, %v334_v11  ;;  %v364_v36 = vadd.f32 %v363_v40, %v242_v19 }
  0xe1   :  { %v443_v44 = vpop.f32.mrf.mxu0 }
  0xe2   :  { %v2610_v48 = vpop.f32.mrf.mxu1  ;;  %v444_v46 = vadd.f32 %v443_v44, %v328_v31 }
  0xe3   :  { %v2596_v47 = vpop.f32.mrf.mxu0 }
  0xe4   :  { %v582_v50 = vpop.f32.mrf.mxu1  ;;  %v465_v12 = vadd.f32 %v2596_v47, %v346_v2  ;;  %v567_v54 = vadd.f32 %v3224_v45, %v444_v46 }
  0xe5   :  { %v457_v49 = vpop.f32.mrf.mxu0 }
  0xe6   :  { %v2613_v53 = vpop.f32.mrf.mxu1  ;;  %v458_v10 = vadd.f32 %v457_v49, %v340_v8  ;;  %v591_v29 = vadd.f32 %v2610_v48, %v465_v12  ;;  %v575_v48 = vadd.f32 %v2607_v42, %v451_v33  ;;  %v866_v42 = vld [vmem:[%s3736_s3 + $0x10] sm:$0xff] }
  0xe7   :  { %v2599_v52 = vpop.f32.mrf.mxu0  ;;  %v928_v13 = vsel %vm920_vm1, %v866_v42, 0 }
  0xe8   :  { %v598_v56 = vpop.f32.mrf.mxu1  ;;  %v479_v21 = vadd.f32 %v2599_v52, %v358_v14  ;;  %v583_v25 = vadd.f32 %v582_v50, %v458_v10  ;;  %v868_v10 = vld [vmem:[%s3736_s3 + $0x20] sm:$0xff]  ;;  %v3264_v33 = vand.u32 4294901760, %v928_v13 }
  0xe9   :  { %v471_v55 = vpop.f32.mrf.mxu0 }
  0xea   :  { %v2616_v59 = vpop.f32.mrf.mxu1  ;;  %v472_v23 = vadd.f32 %v471_v55, %v352_v18  ;;  %v607_v47 = vadd.f32 %v2613_v53, %v479_v21 }
  0xeb   :  { %v2602_v58 = vpop.f32.mrf.mxu0 }
  0xec   :  { %v614_v0 = vpop.f32.mrf.mxu1  ;;  %v493_v32 = vadd.f32 %v2602_v58, %v370_v28  ;;  %v599_v43 = vadd.f32 %v598_v56, %v472_v23  ;;  %v925_v56 = vsel %vm920_vm1, %v865_v37, 0  ;;  %v3300_v37 = vsub.f32 %v928_v13, %v3264_v33 }
  0xed   :  { %v485_v63 = vpop.f32.mrf.mxu0  ;;  %v3241_v12 = vand.u32 4294901760, %v925_v56 }
  0xee   :  { %v2635_v7 = vpop.f32.mrf.mxu1  ;;  %v486_v24 = vadd.f32 %v485_v63, %v364_v36  ;;  %v623_v52 = vadd.f32 %v2616_v59, %v493_v32 }
  0xef   :  { %v2621_v6 = vpop.f32.mrf.mxu0  ;;  %v3262_v31 = vsub.f32 %v925_v56, %v3241_v12 }
  0xf0   :  { %v3226_v3 = vpop.f32.mrf.mxu1  ;;  %v703_v44 = vadd.f32 %v2621_v6, %v575_v48  ;;  %v615_v58 = vadd.f32 %v614_v0, %v486_v24  ;;  %v867_v6 = vld [vmem:[%s3736_s3 + $0x18] sm:$0xff] }
  0xf1   :  { %v696_v15 = vpop.f32.mrf.mxu0 }
  0xf2   :  { %v2638_v27 = vpop.f32.mrf.mxu1  ;;  %v697_v63 = vadd.f32 %v696_v15, %v567_v54  ;;  %v817_v8 = vadd.f32 %v2635_v7, %v703_v44  ;;  %v931_v7 = vsel %vm920_vm1, %v867_v6, 0 }
  0xf3   :  { %v2624_v22 = vpop.f32.mrf.mxu0 }
  0xf4   :  { %v822_v35 = vpop.f32.mrf.mxu1  ;;  %v715_v38 = vadd.f32 %v2624_v22, %v591_v29  ;;  %v811_v11 = vadd.f32 %v3226_v3, %v697_v63  ;;  %v869_v29 = vld [vmem:[%s3736_s3 + $0x28] sm:$0xff]  ;;  %v857_v23 = vmax.f32 %v817_v8, 0.0  ;;  %v934_v3 = vsel %vm920_vm1, %v868_v10, 0 }
  0xf5   :  { %v708_v30 = vpop.f32.mrf.mxu0  ;;  %v937_v46 = vsel %vm920_vm1, %v869_v29, 0  ;;  %v3302_v48 = vand.u32 4294901760, %v934_v3 }
  0xf6   :  { %v2641_v39 = vpop.f32.mrf.mxu1  ;;  %v709_v49 = vadd.f32 %v708_v30, %v583_v25  ;;  %v829_v40 = vadd.f32 %v2638_v27, %v715_v38  ;;  %v856_v32 = vmax.f32 %v811_v11, 0.0  ;;  %v3279_v38 = vand.u32 4294901760, %v931_v7 }
  0xf7   :  { %v2627_v34 = vpop.f32.mrf.mxu0  ;;  %v3295_v24 = vand.u32 4294901760, %v857_v23  ;;  %v3325_v44 = vand.u32 4294901760, %v937_v46 }
  0xf8   :  { %v727_v26 = vadd.f32 %v2627_v34, %v607_v47  ;;  %v834_v51 = vpop.f32.mrf.mxu1  ;;  %v823_v60 = vadd.f32 %v822_v35, %v709_v49  ;;  %v859_v2 = vmax.f32 %v829_v40, 0.0  ;;  %v1030_v49 = vand.u32 4294901760, %v3262_v31  ;;  %v870_v40 = vld [vmem:[%s3736_s3 + $0x30] sm:$0xff] }
  0xf9   :  { %v720_v41 = vpop.f32.mrf.mxu0  ;;  %v3323_v54 = vsub.f32 %v931_v7, %v3279_v38  ;;  %v940_v42 = vsel %vm920_vm1, %v870_v40, 0 }
  0xfa   :  { %v721_v50 = vadd.f32 %v720_v41, %v599_v43  ;;  %v841_v53 = vadd.f32 %v2641_v39, %v727_v26  ;;  %v2644_v57 = vpop.f32.mrf.mxu1  ;;  %v858_v14 = vmax.f32 %v823_v60, 0.0  ;;  %v3251_v21 = vand.u32 4294901760, %v859_v2 }
  0xfb   :  { %v2630_v55 = vpop.f32.mrf.mxu0  ;;  %v3339_v60 = vsub.f32 %v857_v23, %v3295_v24  ;;  %v3368_v13 = vand.u32 4294901760, %v940_v42 }
  0xfc   :  { %v835_v61 = vadd.f32 %v834_v51, %v721_v50  ;;  %v739_v62 = vadd.f32 %v2630_v55, %v623_v52  ;;  %v861_v59 = vmax.f32 %v841_v53, 0.0  ;;  %v846_v9 = vpop.f32.mrf.mxu1  ;;  %v3267_v30 = vand.u32 4294901760, %v858_v14 }
  0xfd   :  { %v732_v1 = vpop.f32.mrf.mxu0  ;;  %v3283_v47 = vsub.f32 %v859_v2, %v3251_v21  ;;  %v3319_v50 = vand.u32 4294901760, %v856_v32  ;;  %v3354_v2 = vsub.f32 %v934_v3, %v3302_v48 }
  0xfe   :  { %v860_v4 = vmax.f32 %v835_v61, 0.0  ;;  %v853_v45 = vadd.f32 %v2644_v57, %v739_v62  ;;  %v733_v5 = vadd.f32 %v732_v1, %v615_v58  ;;  %v3239_v0 = vand.u32 4294901760, %v861_v59  ;;  %v871_v58 = vld [vmem:[%s3736_s3 + $0x38] sm:$0xff] }
  0xff   :  { %v3305_v26 = vsub.f32 %v858_v14, %v3267_v30  ;;  %v3333_v56 = vand.u32 4294901760, %v3283_v47  ;;  %v1031_v61 = vsub.f32 %v3262_v31, %v1030_v49  ;;  %v1040_v62 = vand.u32 4294901760, %v3300_v37 }
 0x100   :  { %v3244_v15 = vand.u32 4294901760, %v860_v4  ;;  %v863_v18 = vmax.f32 %v853_v45, 0.0  ;;  %v847_v19 = vadd.f32 %v846_v9, %v733_v5  ;;  %v3254_v22 = vsub.f32 %v861_v59, %v3239_v0 }
 0x101   :  { %v3351_v1 = vand.u32 4294901760, %v3305_v26  ;;  %v1050_v45 = vand.u32 4294901760, %v3323_v54  ;;  %v943_v5 = vsel %vm920_vm1, %v871_v58, 0  ;;  %v1146_v8 = vsub.f32 %v3283_v47, %v3333_v56 }
 0x102   :  { %v3256_v27 = vand.u32 4294901760, %v863_v18  ;;  %v862_v28 = vmax.f32 %v847_v19, 0.0  ;;  %v3270_v35 = vsub.f32 %v860_v4, %v3244_v15  ;;  %v3293_v43 = vand.u32 4294901760, %v3254_v22 }
 0x103   :  { %v3357_v4 = vsub.f32 %v856_v32, %v3319_v50  ;;  %v3366_v9 = vsub.f32 %v937_v46, %v3325_v44  ;;  %v1032_v14 = vand.u32 4294901760, %v1031_v61  ;;  %v3375_v19 = vand.u32 4294901760, %v3339_v60 }
 0x104   :  { %v3273_v36 = vsub.f32 %v863_v18, %v3256_v27  ;;  %v3275_v25 = vand.u32 4294901760, %v862_v28  ;;  %2645 = vmatprep.subr.mxu0 %v3256_v27  ;;  %v3314_v52 = vand.u32 4294901760, %v3270_v35  ;;  %v1132_v57 = vsub.f32 %v3254_v22, %v3293_v43 }
 0x105   :  { %2646 = vmatpush3.msra.mxu0 %v3256_v27  ;;  %v1041_v18 = vsub.f32 %v3300_v37, %v1040_v62  ;;  %v1153_v11 = vsub.f32 %v3305_v26, %v3351_v1  ;;  %v1060_v7 = vand.u32 4294901760, %v3354_v2  ;;  %v1051_v29 = vsub.f32 %v3323_v54, %v1050_v45 }
 0x106   :  { %v3286_v34 = vsub.f32 %v862_v28, %v3275_v25  ;;  %2647 = vmatprep.subr.mxu0 %v3275_v25  ;;  %v3290_v39 = vand.u32 4294901760, %v3273_v36  ;;  %v1139_v59 = vsub.f32 %v3270_v35, %v3314_v52  ;;  %v1133_v6 = vand.u32 4294901760, %v1132_v57 }
 0x107   :  { %2648 = vmatpush3.msra.mxu0 %v3275_v25  ;;  %v3381_v28 = vand.u32 4294901760, %v943_v5  ;;  %v3388_v23 = vand.u32 4294901760, %v3357_v4  ;;  %v1147_v3 = vand.u32 4294901760, %v1146_v8  ;;  %v1070_v32 = vand.u32 4294901760, %v3366_v9 }
 0x108   :  { %2649 = vmatprep.subr.mxu0 %v3239_v0  ;;  %v1118_v41 = vsub.f32 %v3273_v36, %v3290_v39  ;;  %v3311_v51 = vand.u32 4294901760, %v3286_v34  ;;  %v1140_v10 = vand.u32 4294901760, %v1139_v59  ;;  %v3393_v46 = vsub.f32 %v940_v42, %v3368_v13 }
 0x109   :  { %2650 = vmatpush3.msra.mxu0 %v3239_v0  ;;  %v1160_v40 = vsub.f32 %v3339_v60, %v3375_v19  ;;  %v3402_v57 = vsub.f32 %v943_v5, %v3381_v28  ;;  %v1052_v58 = vand.u32 4294901760, %v1051_v29  ;;  %v1167_v61 = vsub.f32 %v3357_v4, %v3388_v23 }
 0x10a   :  { %2651 = vmatprep.subr.mxu0 %v3244_v15  ;;  %v1119_v53 = vand.u32 4294901760, %v1118_v41  ;;  %v1125_v55 = vsub.f32 %v3286_v34, %v3311_v51  ;;  %v1042_v41 = vand.u32 4294901760, %v1041_v18  ;;  %v1071_v42 = vsub.f32 %v3366_v9, %v1070_v32 }
 0x10b   :  { %2652 = vmatpush3.msra.mxu0 %v3244_v15  ;;  %v1161_v59 = vand.u32 4294901760, %v1160_v40 }
 0x10c   :  { %2653 = vmatprep.subr.mxu0 %v3251_v21  ;;  %2673 = vmatprep.subr.mxu1 %v1119_v53  ;;  %v1126_v63 = vand.u32 4294901760, %v1125_v55  ;;  %v1061_v55 = vsub.f32 %v3354_v2, %v1060_v7  ;;  %v1072_v8 = vand.u32 4294901760, %v1071_v42 }
 0x10d   :  { %2654 = vmatpush3.msra.mxu0 %v3251_v21  ;;  %2674 = vmatpush3.msra.mxu1 %v1119_v53  ;;  %v1154_v53 = vand.u32 4294901760, %v1153_v11 }
 0x10e   :  { %2655 = vmatprep.subr.mxu0 %v3267_v30  ;;  %2675 = vmatprep.subr.mxu1 %v1126_v63  ;;  %v1062_v5 = vand.u32 4294901760, %v1061_v55 }
 0x10f   :  { %2656 = vmatpush3.msra.mxu0 %v3267_v30  ;;  %2676 = vmatpush3.msra.mxu1 %v1126_v63  ;;  %v1080_v63 = vand.u32 4294901760, %v3393_v46 }
 0x110   :  { %2657 = vmatprep.subr.mxu0 %v3295_v24  ;;  %2677 = vmatprep.subr.mxu1 %v1133_v6 }
 0x111   :  { %2658 = vmatpush3.msra.mxu0 %v3295_v24  ;;  %2678 = vmatpush3.msra.mxu1 %v1133_v6  ;;  %v1090_v6 = vand.u32 4294901760, %v3402_v57 }
 0x112   :  { %2659 = vmatprep.subr.mxu0 %v3319_v50  ;;  %2679 = vmatprep.subr.mxu1 %v1140_v10 }
 0x113   :  { %2660 = vmatpush3.msra.mxu0 %v3319_v50  ;;  %2680 = vmatpush3.msra.mxu1 %v1140_v10 }
 0x114   :  { %2662 = vmatmul.mubr.f32.vlgmr.msra.gmra.mxu0 %v1032_v14  ;;  %2681 = vmatprep.subr.mxu1 %v1147_v3  ;;  %v1081_v14 = vsub.f32 %v3393_v46, %v1080_v63 }
 0x115   :  { %2701 = vmatprep.subr.mxu0 %v3273_v36  ;;  %2682 = vmatpush3.msra.mxu1 %v1147_v3 }
 0x116   :  { %2702 = vmatpush3.msra.mxu0 %v3273_v36  ;;  %2683 = vmatprep.subr.mxu1 %v1154_v53  ;;  %v1168_v36 = vand.u32 4294901760, %v1167_v61  ;;  %v1082_v18 = vand.u32 4294901760, %v1081_v14 }
 0x117   :  { %2703 = vmatprep.subr.mxu0 %v3286_v34  ;;  %2664 = vmatprep.mubr.f32.mxu0 %v1042_v41 }
 0x118   :  { %2684 = vmatpush3.msra.mxu1 %v1154_v53  ;;  %2704 = vmatpush3.msra.mxu0 %v3286_v34  ;;  %v1091_v34 = vsub.f32 %v3402_v57, %v1090_v6 }
 0x119   :  { %2665 = vmatmul.mubr.f32.gmra.mxu0 %v1052_v58  ;;  %2685 = vmatprep.subr.mxu1 %v1161_v59 }
 0x11a   :  { %2705 = vmatprep.subr.mxu0 %v3254_v22  ;;  %2686 = vmatpush3.msra.mxu1 %v1161_v59 }
 0x11b   :  { %2706 = vmatpush3.msra.mxu0 %v3254_v22  ;;  %2687 = vmatprep.subr.mxu1 %v1168_v36  ;;  %v1092_v22 = vand.u32 4294901760, %v1091_v34 }
 0x11c   :  { %2707 = vmatprep.subr.mxu0 %v3270_v35  ;;  %2667 = vmatprep.mubr.f32.mxu0 %v1062_v5 }
 0x11d   :  { %2688 = vmatpush3.msra.mxu1 %v1168_v36  ;;  %2708 = vmatpush3.msra.mxu0 %v3270_v35 }
 0x11e   :  { %2668 = vmatmul.mubr.f32.gmra.mxu0 %v1072_v8  ;;  %2690 = vmatmul.mubr.f32.vlgmr.msra.gmra.mxu1 %v3241_v12 }
 0x11f   :  { %2709 = vmatprep.subr.mxu0 %v3283_v47  ;;  %2729 = vmatprep.subr.mxu1 %v3256_v27 }
 0x120   :  { %2710 = vmatpush3.msra.mxu0 %v3283_v47  ;;  %2730 = vmatpush3.msra.mxu1 %v3256_v27 }
 0x121   :  { %2711 = vmatprep.subr.mxu0 %v3305_v26  ;;  %2731 = vmatprep.subr.mxu1 %v3275_v25 }
 0x122   :  { %2670 = vmatprep.mubr.f32.mxu0 %v1082_v18  ;;  %2692 = vmatprep.mubr.f32.mxu1 %v3264_v33 }
 0x123   :  { %2712 = vmatpush3.msra.mxu0 %v3305_v26  ;;  %2732 = vmatpush3.msra.mxu1 %v3275_v25 }
 0x124   :  { %2671 = vmatmul.mubr.f32.gmra.mxu0 %v1092_v22  ;;  %2693 = vmatmul.mubr.f32.gmra.mxu1 %v3279_v38 }
 0x125   :  { %2713 = vmatprep.subr.mxu0 %v3339_v60  ;;  %2733 = vmatprep.subr.mxu1 %v3239_v0 }
 0x126   :  { %2714 = vmatpush3.msra.mxu0 %v3339_v60  ;;  %2734 = vmatpush3.msra.mxu1 %v3239_v0 }
 0x127   :  { %2715 = vmatprep.subr.mxu0 %v3357_v4  ;;  %2735 = vmatprep.subr.mxu1 %v3244_v15 }
 0x128   :  { %2695 = vmatprep.mubr.f32.mxu1 %v3302_v48  ;;  %2716 = vmatpush3.msra.mxu0 %v3357_v4 }
 0x129   :  { %2717 = vmatprep.mubr.f32.mxu0 %v3217_v17  ;;  %2736 = vmatpush3.msra.mxu1 %v3244_v15 }
 0x12a   :  { %2696 = vmatmul.mubr.f32.gmra.mxu1 %v3325_v44  ;;  %2718 = vmatmul.mubr.f32.vlgmr.msra.gmra.mxu0 %v3262_v31 }
 0x12b   :  { %2737 = vmatprep.subr.mxu1 %v3251_v21  ;;  %2757 = vmatprep.subr.mxu0 %v3290_v39 }
 0x12c   :  { %2738 = vmatpush3.msra.mxu1 %v3251_v21  ;;  %2758 = vmatpush3.msra.mxu0 %v3290_v39 }
 0x12d   :  { %2739 = vmatprep.subr.mxu1 %v3267_v30  ;;  %2759 = vmatprep.subr.mxu0 %v3311_v51 }
 0x12e   :  { %2698 = vmatprep.mubr.f32.mxu1 %v3368_v13  ;;  %2720 = vmatprep.mubr.f32.mxu0 %v3300_v37 }
 0x12f   :  { %2740 = vmatpush3.msra.mxu1 %v3267_v30  ;;  %2760 = vmatpush3.msra.mxu0 %v3311_v51 }
 0x130   :  { %2699 = vmatmul.mubr.f32.gmra.mxu1 %v3381_v28  ;;  %2721 = vmatmul.mubr.f32.gmra.mxu0 %v3323_v54  ;;  %v918_v54 = vpop.permute.xlu0 %917 }
 0x131   :  { %2741 = vmatprep.subr.mxu1 %v3295_v24  ;;  %2761 = vmatprep.subr.mxu0 %v3293_v43 }
 0x132   :  { %2742 = vmatpush3.msra.mxu1 %v3295_v24  ;;  %2762 = vmatpush3.msra.mxu0 %v3293_v43 }
 0x133   :  { %2743 = vmatprep.subr.mxu1 %v3319_v50  ;;  %2763 = vmatprep.subr.mxu0 %v3314_v52 }
 0x134   :  { %2723 = vmatprep.mubr.f32.mxu0 %v3354_v2  ;;  %2744 = vmatpush3.msra.mxu1 %v3319_v50  ;;  %v908_v2 = vpop.permute.xlu0 %907 }
 0x135   :  { %2745 = vmatprep.mubr.f32.mxu1 %v1020_v20  ;;  %2764 = vmatpush3.msra.mxu0 %v3314_v52 }
 0x136   :  { %2724 = vmatmul.mubr.f32.gmra.mxu0 %v3366_v9  ;;  %2746 = vmatmul.mubr.f32.vlgmr.msra.gmra.mxu1 %v1030_v49 }
 0x137   :  { %2765 = vmatprep.subr.mxu0 %v3333_v56  ;;  %2785 = vmatprep.subr.mxu1 %v3256_v27 }
 0x138   :  { %2766 = vmatpush3.msra.mxu0 %v3333_v56  ;;  %2786 = vmatpush3.msra.mxu1 %v3256_v27  ;;  %v898_v10 = vpop.permute.xlu0 %897 }
 0x139   :  { %2767 = vmatprep.subr.mxu0 %v3351_v1  ;;  %2787 = vmatprep.subr.mxu1 %v3275_v25 }
 0x13a   :  { %2726 = vmatprep.mubr.f32.mxu0 %v3393_v46  ;;  %2748 = vmatprep.mubr.f32.mxu1 %v1040_v62 }
 0x13b   :  { %2768 = vmatpush3.msra.mxu0 %v3351_v1  ;;  %2788 = vmatpush3.msra.mxu1 %v3275_v25 }
 0x13c   :  { %2727 = vmatmul.mubr.f32.gmra.mxu0 %v3402_v57  ;;  %2749 = vmatmul.mubr.f32.gmra.mxu1 %v1050_v45  ;;  %v888_v40 = vpop.permute.xlu0 %887 }
 0x13d   :  { %2769 = vmatprep.subr.mxu0 %v3375_v19  ;;  %2789 = vmatprep.subr.mxu1 %v3239_v0 }
 0x13e   :  { %2770 = vmatpush3.msra.mxu0 %v3375_v19  ;;  %2790 = vmatpush3.msra.mxu1 %v3239_v0 }
 0x13f   :  { %2771 = vmatprep.subr.mxu0 %v3388_v23  ;;  %2791 = vmatprep.subr.mxu1 %v3244_v15 }
 0x140   :  { %2751 = vmatprep.mubr.f32.mxu1 %v1060_v7  ;;  %2772 = vmatpush3.msra.mxu0 %v3388_v23 }
 0x141   :  { %2773 = vmatprep.mubr.f32.mxu0 %v3214_v16  ;;  %2792 = vmatpush3.msra.mxu1 %v3244_v15 }
 0x142   :  { %2752 = vmatmul.mubr.f32.gmra.mxu1 %v1070_v32  ;;  %2774 = vmatmul.mubr.f32.vlgmr.msra.gmra.mxu0 %v3241_v12 }
 0x143   :  { %2793 = vmatprep.subr.mxu1 %v3251_v21  ;;  %2754 = vmatprep.mubr.f32.mxu1 %v1080_v63 }
 0x144   :  { %2794 = vmatpush3.msra.mxu1 %v3251_v21  ;;  %2776 = vmatprep.mubr.f32.mxu0 %v3264_v33 }
 0x145   :  { %2795 = vmatprep.subr.mxu1 %v3267_v30 }
 0x146   :  { %2796 = vmatpush3.msra.mxu1 %v3267_v30  ;;  %2777 = vmatmul.mubr.f32.gmra.mxu0 %v3279_v38 }
 0x147   :  { %2755 = vmatmul.mubr.f32.gmra.mxu1 %v1090_v6  ;;  %2797 = vmatprep.subr.mxu1 %v3295_v24 }
 0x148   :  { %2798 = vmatpush3.msra.mxu1 %v3295_v24  ;;  %2779 = vmatprep.mubr.f32.mxu0 %v3302_v48 }
 0x149   :  { %2799 = vmatprep.subr.mxu1 %v3319_v50  ;;  %2801 = vmatprep.mubr.f32.mxu1 %v3214_v16  ;;  %v2956_v16 = vmov 0.0  }
 0x14a   :  { %2800 = vmatpush3.msra.mxu1 %v3319_v50  ;;  %2780 = vmatmul.mubr.f32.gmra.mxu0 %v3325_v44 }
 0x14b   :  { %2802 = vmatmul.mubr.f32.vlgmr.msra.gmra.mxu1 %v3241_v12  ;;  %2782 = vmatprep.mubr.f32.mxu0 %v3368_v13 }
 0x14c   :  { %2804 = vmatprep.mubr.f32.mxu1 %v3264_v33  ;;  %2813 = vmatprep.subr.mxu0 %v2956_v16 }
 0x14d   :  { %2832 = vmatprep.subr.mxu1 %v2956_v16 }
 0x14e   :  { %2783 = vmatmul.mubr.f32.gmra.mxu0 %v3381_v28 }
 0x14f   :  { %2805 = vmatmul.mubr.f32.gmra.mxu1 %v3279_v38  ;;  %2829 = vmatprep.mubr.msk.f32.mxu0 %vm2957_vm2, %v2956_v16 }
 0x150   :  { %2807 = vmatprep.mubr.f32.mxu1 %v3302_v48 }
 0x153   :  { %2808 = vmatmul.mubr.f32.gmra.mxu1 %v3325_v44  ;;  %v913_v44 = vpop.permute.xlu1 %912 }
 0x154   :  { %2810 = vmatprep.mubr.f32.mxu1 %v3368_v13 }
 0x157   :  { %2811 = vmatmul.mubr.f32.gmra.mxu1 %v3381_v28  ;;  %v903_v4 = vpop.permute.xlu1 %902 }
 0x158   :  { %2848 = vmatprep.mubr.msk.f32.mxu1 %vm2957_vm2, %v2956_v16 }
 0x15b   :  { %v893_v28 = vpop.permute.xlu1 %892 }
 0x15f   :  { %v883_v59 = vpop.permute.xlu1 %882 }
 0x1d4   :  { %v2663_v17 = vpop.f32.mrf.mxu0 }
 0x1d5   :  { %v1035_v57 = vadd.f32 %v2663_v17, %v888_v40 }
 0x1d6   :  { %v1024_v20 = vpop.f32.mrf.mxu0 }
 0x1d7   :  { %v1025_v8 = vadd.f32 %v1024_v20, %v883_v59 }
 0x1d9   :  { %v2666_v0 = vpop.f32.mrf.mxu0 }
 0x1da   :  { %v1055_v3 = vadd.f32 %v2666_v0, %v898_v10 }
 0x1db   :  { %v1044_v12 = vpop.f32.mrf.mxu0 }
 0x1dc   :  { %v1045_v53 = vadd.f32 %v1044_v12, %v893_v28 }
 0x1de   :  { %v2669_v15 = vpop.f32.mrf.mxu0  ;;  %v2691_v21 = vpop.f32.mrf.mxu1 }
 0x1df   :  { %v1075_v46 = vadd.f32 %v2669_v15, %v908_v2  ;;  %v1212_v14 = vadd.f32 %v2691_v21, %v1035_v57 }
 0x1e0   :  { %v1064_v27 = vpop.f32.mrf.mxu0  ;;  %v1205_v31 = vpop.f32.mrf.mxu1 }
 0x1e1   :  { %v1065_v58 = vadd.f32 %v1064_v27, %v903_v4  ;;  %v1206_v12 = vadd.f32 %v1205_v31, %v1025_v8 }
 0x1e4   :  { %v2672_v33 = vpop.f32.mrf.mxu0  ;;  %v2694_v30 = vpop.f32.mrf.mxu1 }
 0x1e5   :  { %v1224_v55 = vadd.f32 %v2694_v30, %v1055_v3  ;;  %v1095_v5 = vadd.f32 %v2672_v33, %v918_v54 }
 0x1e6   :  { %v1084_v35 = vpop.f32.mrf.mxu0  ;;  %v1217_v25 = vpop.f32.mrf.mxu1 }
 0x1e7   :  { %v1218_v6 = vadd.f32 %v1217_v25, %v1045_v53  ;;  %v1085_v0 = vadd.f32 %v1084_v35, %v913_v44  ;;  %v1791_v35 = vld [vmem:[%s3738_s5] sm:$0x3]  ;;  %s2958_s5 = smov [#allocation2]  }
 0x1e8   :  { %s2348_s15 = sshll.u32 %s2958_s5, 4  ;;  %s2349_s15 = int_to_ptr.vmem [resolvable:$true] %s2348_s15 }
 0x1e9   :  { %s2933_s16 = scalar_lea.vmem %s2349_s15, 32  ;;  %p2938_p1 = scmp.lt.s32.totalorder %s2349_s15, %s2349_s15 }
 0x1ea   :  { %v2697_v38 = vpop.f32.mrf.mxu1  ;;  %v2719_v47 = vpop.f32.mrf.mxu0  ;;  %p2934_p0 = scmp.ne.s32.totalorder %s2349_s15, %s2933_s16  ;;  %p2939_p2 = scmp.lt.s32.totalorder %s2933_s16, %s2933_s16 }
 0x1eb   :  { %v1236_v61 = vadd.f32 %v2697_v38, %v1075_v46  ;;  %v1343_v30 = vadd.f32 %v2719_v47, %v1212_v14 }
 0x1ec   :  { %v1229_v39 = vpop.f32.mrf.mxu1  ;;  %v1335_v43 = vpop.f32.mrf.mxu0  ;;  %p2940_p3 = por %p2939_p2, %p2938_p1 }
 0x1ed   :  { %v1230_v34 = vadd.f32 %v1229_v39, %v1065_v58 }
 0x1ee   :  { %p2941_p4 = pnand %p2940_p3, %p2934_p0 }
 0x1f0   :  { %v2700_v24 = vpop.f32.mrf.mxu1  ;;  %v2722_v49 = vpop.f32.mrf.mxu0 }
 0x1f1   :  { %v1357_v36 = vadd.f32 %v2722_v49, %v1224_v55  ;;  %v1248_v15 = vadd.f32 %v2700_v24, %v1095_v5  ;;  %v1336_v49 = vadd.f32 %v1335_v43, %v1206_v12 }
 0x1f2   :  { %v1241_v37 = vpop.f32.mrf.mxu1  ;;  %v1349_v48 = vpop.f32.mrf.mxu0 }
 0x1f3   :  { %v1350_v2 = vadd.f32 %v1349_v48, %v1218_v6  ;;  %v1242_v28 = vadd.f32 %v1241_v37, %v1085_v0 }
 0x1f6   :  { %v2725_v26 = vpop.f32.mrf.mxu0  ;;  %v2747_v51 = vpop.f32.mrf.mxu1 }
 0x1f7   :  { %v1371_v18 = vadd.f32 %v2725_v26, %v1236_v61  ;;  %v1474_v20 = vadd.f32 %v2747_v51, %v1343_v30 }
 0x1f8   :  { %v1363_v52 = vpop.f32.mrf.mxu0  ;;  %v3534_v50 = vpop.f32.mrf.mxu1 }
 0x1f9   :  { %v1364_v17 = vadd.f32 %v1363_v52, %v1230_v34  ;;  %v1466_v52 = vadd.f32 %v3534_v50, %v1336_v49 }
 0x1fc   :  { %v2728_v56 = vpop.f32.mrf.mxu0  ;;  %v2750_v60 = vpop.f32.mrf.mxu1 }
 0x1fd   :  { %v1490_v10 = vadd.f32 %v2750_v60, %v1357_v36  ;;  %v1385_v3 = vadd.f32 %v2728_v56, %v1248_v15 }
 0x1fe   :  { %v1377_v62 = vpop.f32.mrf.mxu0  ;;  %v1481_v1 = vpop.f32.mrf.mxu1 }
 0x1ff   :  { %v1482_v33 = vadd.f32 %v1481_v1, %v1350_v2  ;;  %v1378_v24 = vadd.f32 %v1377_v62, %v1242_v28 }
 0x202   :  { %v2753_v45 = vpop.f32.mrf.mxu1  ;;  %v2775_v9 = vpop.f32.mrf.mxu0 }
 0x203   :  { %v1506_v27 = vadd.f32 %v2753_v45, %v1371_v18  ;;  %v1623_v54 = vadd.f32 %v2775_v9, %v1474_v20  ;;  %v1799_v45 = vsel %vm920_vm1, %v1791_v35, 0 }
 0x204   :  { %v1497_v13 = vpop.f32.mrf.mxu1  ;;  %v1616_v19 = vpop.f32.mrf.mxu0  ;;  %v3543_v57 = vand.u32 4294901760, %v1799_v45 }
 0x205   :  { %v1498_v21 = vadd.f32 %v1497_v13, %v1364_v17  ;;  %v1617_v13 = vadd.f32 %v1616_v19, %v1466_v52 }
 0x206   :  { %v2778_v11 = vpop.f32.mrf.mxu0  ;;  %v3555_v36 = vsub.f32 %v1799_v45, %v3543_v57 }
 0x207   :  { %v2756_v7 = vpop.f32.mrf.mxu1  ;;  %v1635_v25 = vadd.f32 %v2778_v11, %v1490_v10 }
 0x208   :  { %v1628_v29 = vpop.f32.mrf.mxu0  ;;  %v1522_v31 = vadd.f32 %v2756_v7, %v1385_v3  ;;  %v1876_v30 = vand.u32 4294901760, %v3555_v36 }
 0x209   :  { %v1513_v23 = vpop.f32.mrf.mxu1  ;;  %v1629_v47 = vadd.f32 %v1628_v29, %v1482_v33 }
 0x20a   :  { %v2781_v32 = vpop.f32.mrf.mxu0  ;;  %v1514_v43 = vadd.f32 %v1513_v23, %v1378_v24  ;;  %v1877_v20 = vsub.f32 %v3555_v36, %v1876_v30 }
 0x20b   :  { %v2803_v41 = vpop.f32.mrf.mxu1  ;;  %v1647_v39 = vadd.f32 %v2781_v32, %v1506_v27 }
 0x20c   :  { %v1640_v42 = vpop.f32.mrf.mxu0  ;;  %v1744_v11 = vadd.f32 %v2803_v41, %v1623_v54 }
 0x20d   :  { %v1737_v63 = vpop.f32.mrf.mxu1  ;;  %v1641_v37 = vadd.f32 %v1640_v42, %v1498_v21 }
 0x20e   :  { %v2784_v38 = vpop.f32.mrf.mxu0  ;;  %v1738_v53 = vadd.f32 %v1737_v63, %v1617_v13  ;;  %v1784_v42 = vmax.f32 %v1744_v11, 0.0 }
 0x20f   :  { %v2806_v22 = vpop.f32.mrf.mxu1  ;;  %v1659_v51 = vadd.f32 %v2784_v38, %v1522_v31 }
 0x210   :  { %v1756_v48 = vadd.f32 %v2806_v22, %v1635_v25  ;;  %v1652_v44 = vpop.f32.mrf.mxu0  ;;  %v1783_v6 = vmax.f32 %v1738_v53, 0.0  ;;  %v3568_v22 = vand.u32 4294901760, %v1784_v42 }
 0x211   :  { %v1749_v4 = vpop.f32.mrf.mxu1  ;;  %v1653_v29 = vadd.f32 %v1652_v44, %v1514_v43 }
 0x212   :  { %v1750_v1 = vadd.f32 %v1749_v4, %v1629_v47  ;;  %v1786_v7 = vmax.f32 %v1756_v48, 0.0  ;;  %v3580_v12 = vand.u32 4294901760, %v1783_v6  ;;  %v3594_v28 = vsub.f32 %v1784_v42, %v3568_v22 }
 0x213   :  { %v2809_v26 = vpop.f32.mrf.mxu1  ;;  %v1878_v48 = vand.u32 4294901760, %v1877_v20 }
 0x214   :  { %v1768_v56 = vadd.f32 %v2809_v26, %v1647_v39  ;;  %v1785_v23 = vmax.f32 %v1750_v1, 0.0  ;;  %v3547_v19 = vand.u32 4294901760, %v1786_v7  ;;  %v3610_v21 = vsub.f32 %v1783_v6, %v3580_v12 }
 0x215   :  { %v1761_v60 = vpop.f32.mrf.mxu1  ;;  %v1945_v24 = vand.u32 4294901760, %v3594_v28 }
 0x216   :  { %v1788_v32 = vmax.f32 %v1768_v56, 0.0  ;;  %v1762_v46 = vadd.f32 %v1761_v60, %v1641_v37  ;;  %v3557_v8 = vand.u32 4294901760, %v1785_v23  ;;  %v3572_v0 = vsub.f32 %v1786_v7, %v3547_v19 }
 0x217   :  { %v2812_v62 = vpop.f32.mrf.mxu1  ;;  %v1952_v52 = vand.u32 4294901760, %v3610_v21  ;;  %v1946_v44 = vsub.f32 %v3594_v28, %v1945_v24 }
 0x218   :  { %v1780_v40 = vadd.f32 %v2812_v62, %v1659_v51  ;;  %v3541_v50 = vand.u32 4294901760, %v1788_v32  ;;  %v1787_v9 = vmax.f32 %v1762_v46, 0.0  ;;  %v3585_v17 = vsub.f32 %v1785_v23, %v3557_v8 }
 0x219   :  { %v1773_v55 = vpop.f32.mrf.mxu1  ;;  %v1931_v3 = vand.u32 4294901760, %v3572_v0  ;;  %v1953_v60 = vsub.f32 %v3610_v21, %v1952_v52  ;;  %v1947_v51 = vand.u32 4294901760, %v1946_v44 }
 0x21a   :  { %v1790_v58 = vmax.f32 %v1780_v40, 0.0  ;;  %v1774_v61 = vadd.f32 %v1773_v55, %v1653_v29  ;;  %v3545_v59 = vand.u32 4294901760, %v1787_v9  ;;  %v3550_v41 = vsub.f32 %v1788_v32, %v3541_v50  ;;  %v1796_v40 = vpop.permute.xlu0 %1795 }
 0x21b   :  { %v1938_v39 = vand.u32 4294901760, %v3585_v17  ;;  %v1932_v31 = vsub.f32 %v3572_v0, %v1931_v3  ;;  %v1954_v1 = vand.u32 4294901760, %v1953_v60 }
 0x21c   :  { %v3552_v5 = vand.u32 4294901760, %v1790_v58  ;;  %v1789_v63 = vmax.f32 %v1774_v61, 0.0  ;;  %v3560_v14 = vsub.f32 %v1787_v9, %v3545_v59  ;;  %v1917_v15 = vand.u32 4294901760, %v3550_v41 }
 0x21d   :  { %v1939_v54 = vsub.f32 %v3585_v17, %v1938_v39  ;;  %v1933_v56 = vand.u32 4294901760, %v1932_v31 }
 0x21e   :  { %v3563_v34 = vsub.f32 %v1790_v58, %v3552_v5  ;;  %v3565_v18 = vand.u32 4294901760, %v1789_v63  ;;  %2814 = vmatpush3.msra.mxu0 %v3552_v5  ;;  %v1924_v27 = vand.u32 4294901760, %v3560_v14  ;;  %v1918_v33 = vsub.f32 %v3550_v41, %v1917_v15 }
 0x21f   :  { %2815 = vmatprep.subr.mxu0 %v2956_v16  ;;  %v1940_v43 = vand.u32 4294901760, %v1939_v54 }
 0x220   :  { %v1903_v2 = vand.u32 4294901760, %v3563_v34  ;;  %v3577_v10 = vsub.f32 %v1789_v63, %v3565_v18  ;;  %2816 = vmatpush3.msra.mxu0 %v3565_v18  ;;  %v1925_v26 = vsub.f32 %v3560_v14, %v1924_v27  ;;  %v1919_v47 = vand.u32 4294901760, %v1918_v33 }
 0x221   :  { %2817 = vmatprep.subr.mxu0 %v2956_v16 }
 0x222   :  { %v1904_v38 = vsub.f32 %v3563_v34, %v1903_v2  ;;  %v1910_v4 = vand.u32 4294901760, %v3577_v10  ;;  %2818 = vmatpush3.msra.mxu0 %v3541_v50  ;;  %v1926_v37 = vand.u32 4294901760, %v1925_v26 }
 0x223   :  { %2819 = vmatprep.subr.mxu0 %v2956_v16 }
 0x224   :  { %v1911_v25 = vsub.f32 %v3577_v10, %v1910_v4  ;;  %2820 = vmatpush3.msra.mxu0 %v3545_v59  ;;  %v1905_v49 = vand.u32 4294901760, %v1904_v38 }
 0x225   :  { %2821 = vmatprep.subr.mxu0 %v2956_v16 }
 0x226   :  { %2822 = vmatpush3.msra.mxu0 %v3547_v19  ;;  %2833 = vmatpush3.msra.mxu1 %v1905_v49  ;;  %v1912_v35 = vand.u32 4294901760, %v1911_v25 }
 0x227   :  { %2823 = vmatprep.subr.mxu0 %v2956_v16  ;;  %2834 = vmatprep.subr.mxu1 %v2956_v16 }
 0x228   :  { %2824 = vmatpush3.msra.mxu0 %v3557_v8  ;;  %2835 = vmatpush3.msra.mxu1 %v1912_v35 }
 0x229   :  { %2825 = vmatprep.subr.mxu0 %v2956_v16  ;;  %2836 = vmatprep.subr.mxu1 %v2956_v16 }
 0x22a   :  { %2826 = vmatpush3.msra.mxu0 %v3568_v22  ;;  %2837 = vmatpush3.msra.mxu1 %v1919_v47 }
 0x22b   :  { %2827 = vmatprep.subr.mxu0 %v2956_v16  ;;  %2838 = vmatprep.subr.mxu1 %v2956_v16 }
 0x22c   :  { %2828 = vmatpush3.msra.mxu0 %v3580_v12  ;;  %2839 = vmatpush3.msra.mxu1 %v1926_v37 }
 0x22d   :  { %2830 = vmatmul.mubr.f32.vlgmr.msra.gmra.mxu0 %v1878_v48  ;;  %2840 = vmatprep.subr.mxu1 %v2956_v16 }
 0x22e   :  { %2851 = vmatprep.subr.mxu0 %v2956_v16  ;;  %2841 = vmatpush3.msra.mxu1 %v1933_v56 }
 0x22f   :  { %2852 = vmatpush3.msra.mxu0 %v3563_v34  ;;  %2842 = vmatprep.subr.mxu1 %v2956_v16 }
 0x230   :  { %2853 = vmatprep.subr.mxu0 %v2956_v16  ;;  %2843 = vmatpush3.msra.mxu1 %v1940_v43 }
 0x231   :  { %2854 = vmatpush3.msra.mxu0 %v3577_v10  ;;  %2844 = vmatprep.subr.mxu1 %v2956_v16 }
 0x232   :  { %2855 = vmatprep.subr.mxu0 %v2956_v16  ;;  %2845 = vmatpush3.msra.mxu1 %v1947_v51 }
 0x233   :  { %2856 = vmatpush3.msra.mxu0 %v3550_v41  ;;  %2846 = vmatprep.subr.mxu1 %v2956_v16 }
 0x234   :  { %2857 = vmatprep.subr.mxu0 %v2956_v16  ;;  %2847 = vmatpush3.msra.mxu1 %v1954_v1 }
 0x235   :  { %2858 = vmatpush3.msra.mxu0 %v3560_v14  ;;  %2849 = vmatmul.mubr.f32.vlgmr.msra.gmra.mxu1 %v3543_v57 }
 0x236   :  { %2859 = vmatprep.subr.mxu0 %v2956_v16  ;;  %2870 = vmatprep.subr.mxu1 %v2956_v16 }
 0x237   :  { %2860 = vmatpush3.msra.mxu0 %v3572_v0  ;;  %2871 = vmatpush3.msra.mxu1 %v3552_v5 }
 0x238   :  { %2861 = vmatprep.subr.mxu0 %v2956_v16  ;;  %2872 = vmatprep.subr.mxu1 %v2956_v16 }
 0x239   :  { %2862 = vmatpush3.msra.mxu0 %v3585_v17  ;;  %2873 = vmatpush3.msra.mxu1 %v3565_v18 }
 0x23a   :  { %2863 = vmatprep.subr.mxu0 %v2956_v16  ;;  %2874 = vmatprep.subr.mxu1 %v2956_v16 }
 0x23b   :  { %2864 = vmatpush3.msra.mxu0 %v3594_v28  ;;  %2875 = vmatpush3.msra.mxu1 %v3541_v50 }
 0x23c   :  { %2865 = vmatprep.subr.mxu0 %v2956_v16  ;;  %2876 = vmatprep.subr.mxu1 %v2956_v16 }
 0x23d   :  { %2866 = vmatpush3.msra.mxu0 %v3610_v21  ;;  %2867 = vmatprep.mubr.msk.f32.mxu0 %vm2957_vm2, %v2956_v16 }
 0x23e   :  { %2877 = vmatpush3.msra.mxu1 %v3545_v59  ;;  %2868 = vmatmul.mubr.f32.vlgmr.msra.gmra.mxu0 %v3555_v36 }
 0x23f   :  { %2878 = vmatprep.subr.mxu1 %v2956_v16  ;;  %2889 = vmatprep.subr.mxu0 %v2956_v16 }
 0x240   :  { %2879 = vmatpush3.msra.mxu1 %v3547_v19  ;;  %2890 = vmatpush3.msra.mxu0 %v1903_v2 }
 0x241   :  { %2880 = vmatprep.subr.mxu1 %v2956_v16  ;;  %2891 = vmatprep.subr.mxu0 %v2956_v16 }
 0x242   :  { %2881 = vmatpush3.msra.mxu1 %v3557_v8  ;;  %2892 = vmatpush3.msra.mxu0 %v1910_v4 }
 0x243   :  { %2882 = vmatprep.subr.mxu1 %v2956_v16  ;;  %2893 = vmatprep.subr.mxu0 %v2956_v16 }
 0x244   :  { %2883 = vmatpush3.msra.mxu1 %v3568_v22  ;;  %2894 = vmatpush3.msra.mxu0 %v1917_v15 }
 0x245   :  { %2884 = vmatprep.subr.mxu1 %v2956_v16  ;;  %2895 = vmatprep.subr.mxu0 %v2956_v16 }
 0x246   :  { %2885 = vmatpush3.msra.mxu1 %v3580_v12  ;;  %2886 = vmatprep.mubr.msk.f32.mxu1 %vm2957_vm2, %v2956_v16 }
 0x247   :  { %2896 = vmatpush3.msra.mxu0 %v1924_v27  ;;  %2887 = vmatmul.mubr.f32.vlgmr.msra.gmra.mxu1 %v1876_v30 }
 0x248   :  { %2897 = vmatprep.subr.mxu0 %v2956_v16  ;;  %2908 = vmatprep.subr.mxu1 %v2956_v16 }
 0x249   :  { %2898 = vmatpush3.msra.mxu0 %v1931_v3  ;;  %2909 = vmatpush3.msra.mxu1 %v3552_v5 }
 0x24a   :  { %2899 = vmatprep.subr.mxu0 %v2956_v16  ;;  %2910 = vmatprep.subr.mxu1 %v2956_v16 }
 0x24b   :  { %2900 = vmatpush3.msra.mxu0 %v1938_v39  ;;  %2911 = vmatpush3.msra.mxu1 %v3565_v18 }
 0x24c   :  { %2901 = vmatprep.subr.mxu0 %v2956_v16  ;;  %2912 = vmatprep.subr.mxu1 %v2956_v16 }
 0x24d   :  { %2902 = vmatpush3.msra.mxu0 %v1945_v24  ;;  %2913 = vmatpush3.msra.mxu1 %v3541_v50 }
 0x24e   :  { %2903 = vmatprep.subr.mxu0 %v2956_v16  ;;  %2914 = vmatprep.subr.mxu1 %v2956_v16 }
 0x24f   :  { %2904 = vmatpush3.msra.mxu0 %v1952_v52  ;;  %2905 = vmatprep.mubr.msk.f32.mxu0 %vm2957_vm2, %v2956_v16 }
 0x250   :  { %2915 = vmatpush3.msra.mxu1 %v3545_v59  ;;  %2906 = vmatmul.mubr.f32.vlgmr.msra.gmra.mxu0 %v3543_v57 }
 0x251   :  { %2916 = vmatprep.subr.mxu1 %v2956_v16  ;;  %2924 = vmatprep.mubr.msk.f32.mxu1 %vm2957_vm2, %v2956_v16 }
 0x252   :  { %2917 = vmatpush3.msra.mxu1 %v3547_v19 }
 0x253   :  { %2918 = vmatprep.subr.mxu1 %v2956_v16 }
 0x254   :  { %2919 = vmatpush3.msra.mxu1 %v3557_v8 }
 0x255   :  { %2920 = vmatprep.subr.mxu1 %v2956_v16 }
 0x256   :  { %2921 = vmatpush3.msra.mxu1 %v3568_v22 }
 0x257   :  { %2922 = vmatprep.subr.mxu1 %v2956_v16 }
 0x258   :  { %2923 = vmatpush3.msra.mxu1 %v3580_v12 }
 0x259   :  { %2925 = vmatmul.mubr.f32.vlgmr.msra.gmra.mxu1 %v3543_v57 }
 0x2ed   :  { %v1880_v45 = vpop.f32.mrf.mxu0 }
 0x2ee   :  { %v1881_v53 = vadd.f32 %v1880_v45, %v1796_v40 }
 0x2ef   :  { %v2831_v13 = vpop.f32.mrf.mxu0 }
 0x2f5   :  { %v1991_v11 = vpop.f32.mrf.mxu1 }
 0x2f6   :  { %v1992_v9 = vadd.f32 %v1991_v11, %v1881_v53 }
 0x2f7   :  { %v2850_v32 = vpop.f32.mrf.mxu1 }
 0x2fe   :  { %v2079_v46 = vpop.f32.mrf.mxu0 }
 0x2ff   :  { %v2080_v23 = vadd.f32 %v2079_v46, %v1992_v9 }
 0x300   :  { %v2869_v62 = vpop.f32.mrf.mxu0 }
 0x307   :  { %v2160_v7 = vpop.f32.mrf.mxu1 }
 0x308   :  { %v2161_v58 = vadd.f32 %v2160_v7, %v2080_v23 }
 0x309   :  { %v2888_v29 = vpop.f32.mrf.mxu1 }
 0x310   :  { %v2255_v50 = vpop.f32.mrf.mxu0 }
 0x311   :  { %v2256_v16 = vadd.f32 %v2255_v50, %v2161_v58 }
 0x312   :  { %v2907_v55 = vpop.f32.mrf.mxu0 }
 0x319   :  { %v2334_v61 = vpop.f32.mrf.mxu1 }
 0x31a   :  { %v2335_v57 = vadd.f32 %v2334_v61, %v2256_v16 }
 0x31b   :  { %v2926_v42 = vpop.f32.mrf.mxu1 }
 0x31c   :  { %v2356_v59 = vclamps-f32 %v2335_v57, 1.0 }
 0x31e   :  { %2341 = vst.msk [vmem:[#allocation2] sm:$0x3] %vm2340_vm3, %v2356_v59 }
 0x31f   :  { %2944 = shalt.err (!%p2941_p4)
}
 0x320   :  { %2351 = dma.vmem_to_hbm [thread:$0]  %s2349_s15, 32, %s3740_s7, [#allocation3]  }
 0x321   :  { %2953 = dma.done.wait [#allocation3], 32  }
 0x322   :  { %2954 = vsyncadd [#allocation3], 4294967264 }
 0x323   :  { %2355 = vsyncpa [#allocation3], 1 }

</bundles_post_ra>
